<compile_context>
chip_gen: v7x
topology: tpu7x:2x2x1
jax: 0.10.0
libtpu: 0.0.40
codegen_flags: <defaults>
</compile_context>

<pallas_src>
import functools

import jax
import jax.numpy as jnp
from jax.experimental import pallas as pl
from jax.experimental.pallas import tpu as pltpu


def _rup(x, m):
    return (x + m - 1) // m * m


# ----------------------------------------------------------------------------
# Pallas kernels
# ----------------------------------------------------------------------------

def _matmul_bn_kernel(x_ref, w_ref, s_ref, b_ref, *rest, relu, has_res):
    """Tiled matmul, f32 accumulate into the resident output block, fused
    scale/bias (+ residual) (+ ReLU) epilogue on the last K step."""
    if has_res:
        r_ref, o_ref = rest
    else:
        (o_ref,) = rest

    k = pl.program_id(2)

    @pl.when(k == 0)
    def _():
        o_ref[...] = jnp.zeros_like(o_ref)

    o_ref[...] += jnp.dot(x_ref[...], w_ref[...],
                          preferred_element_type=jnp.float32)

    @pl.when(k == pl.num_programs(2) - 1)
    def _():
        y = o_ref[...] * s_ref[...] + b_ref[...]
        if has_res:
            y = y + r_ref[...]
        if relu:
            y = jnp.maximum(y, 0.0)
        o_ref[...] = y


@functools.partial(jax.jit, static_argnames=("relu",))
def matmul_fused(x, w, scale, bias, residual=None, *, relu):
    """y = (x @ w) * scale + bias [+ residual] [relu].  scale/bias shape (N,).

    x/w are cast to bf16 for the MXU; accumulation and epilogue stay f32.
    """
    M, K = x.shape
    _, N = w.shape

    tm = min(256, _rup(M, 8))
    tn = min(256, _rup(N, 128))
    tk = min(256, _rup(K, 128))
    Mp, Np, Kp = _rup(M, tm), _rup(N, tn), _rup(K, tk)

    xp = jnp.pad(x.astype(jnp.bfloat16), ((0, Mp - M), (0, Kp - K)))
    wp = jnp.pad(w.astype(jnp.bfloat16), ((0, Kp - K), (0, Np - N)))
    sp = jnp.pad(scale.astype(jnp.float32).reshape(1, N),
                 ((0, 0), (0, Np - N)))
    bp = jnp.pad(bias.astype(jnp.float32).reshape(1, N),
                 ((0, 0), (0, Np - N)))

    has_res = residual is not None
    inputs = [xp, wp, sp, bp]
    in_specs = [
        pl.BlockSpec((tm, tk), lambda i, j, k: (i, k)),
        pl.BlockSpec((tk, tn), lambda i, j, k: (k, j)),
        pl.BlockSpec((1, tn), lambda i, j, k: (0, j)),
        pl.BlockSpec((1, tn), lambda i, j, k: (0, j)),
    ]
    if has_res:
        rp = jnp.pad(residual.astype(jnp.float32),
                     ((0, Mp - M), (0, Np - N)))
        inputs.append(rp)
        in_specs.append(pl.BlockSpec((tm, tn), lambda i, j, k: (i, j)))

    out = pl.pallas_call(
        functools.partial(_matmul_bn_kernel, relu=relu, has_res=has_res),
        out_shape=jax.ShapeDtypeStruct((Mp, Np), jnp.float32),
        grid=(Mp // tm, Np // tn, Kp // tk),
        in_specs=in_specs,
        out_specs=pl.BlockSpec((tm, tn), lambda i, j, k: (i, j)),
        compiler_params=pltpu.CompilerParams(
            dimension_semantics=("parallel", "parallel", "arbitrary"),
            vmem_limit_bytes=32 * 1024 * 1024),
    )(*inputs)
    return out[:M, :N]


def _max9_kernel(*refs):
    *in_refs, o_ref = refs
    m = in_refs[0][...]
    for r in in_refs[1:]:
        m = jnp.maximum(m, r[...])
    o_ref[...] = m


def _max9(wins):
    """Elementwise max over 9 (M, C) views, row-tiled and pipelined."""
    M, C = wins[0].shape
    tm = min(512, _rup(M, 8))
    Mp = _rup(M, tm)
    wp = [jnp.pad(w, ((0, Mp - M), (0, 0)), constant_values=-jnp.inf)
          for w in wins]
    out = pl.pallas_call(
        _max9_kernel,
        out_shape=jax.ShapeDtypeStruct((Mp, C), jnp.float32),
        grid=(Mp // tm,),
        in_specs=[pl.BlockSpec((tm, C), lambda i: (i, 0))] * 9,
        out_specs=pl.BlockSpec((tm, C), lambda i: (i, 0)),
        compiler_params=pltpu.CompilerParams(
            dimension_semantics=("parallel",)),
    )(*wp)
    return out[:M]


def _mean_kernel(x_ref, o_ref):
    hw = x_ref.shape[1]
    o_ref[...] = jnp.sum(x_ref[...], axis=1) * (1.0 / hw)


@jax.jit
def global_avg_pool(x):  # x: (N, HW, C) -> (N, C)
    N, HW, C = x.shape
    return pl.pallas_call(
        _mean_kernel,
        out_shape=jax.ShapeDtypeStruct((N, C), jnp.float32),
        grid=(1,),
        in_specs=[pl.BlockSpec((N, HW, C), lambda i: (0, 0, 0))],
        out_specs=pl.BlockSpec((N, C), lambda i: (0, 0)),
    )(x)


# ----------------------------------------------------------------------------
# JAX glue: im2col (3x3 / 7x7 only), conv+BN wrapper, max-pool windows
# ----------------------------------------------------------------------------
# TODO(synk): streaming the kh*kw K-slabs directly from the padded NHWC
# activation inside the matmul pipeline (no im2col materialization) needs
# Element-offset index maps; kept as JAX-side im2col for 3x3/7x7 here.

def _im2col(x, kh, kw, stride, pad):
    # x: NHWC (bf16)
    if pad:
        x = jnp.pad(x, ((0, 0), (pad, pad), (pad, pad), (0, 0)))
    N, H, W, C = x.shape
    Ho = (H - kh) // stride + 1
    Wo = (W - kw) // stride + 1
    cols = []
    for i in range(kh):
        for j in range(kw):
            cols.append(x[:, i:i + Ho * stride:stride,
                          j:j + Wo * stride:stride, :])
    cols = jnp.concatenate(cols, axis=-1)              # (N, Ho, Wo, kh*kw*C)
    return cols.reshape(N * Ho * Wo, kh * kw * C), N, Ho, Wo


@functools.partial(jax.jit, static_argnames=("stride", "pad", "relu"))
def conv_bn(x, w_oihw, scale, bias, residual=None, *, stride, pad, relu):
    """conv2d (no bias, PyTorch OIHW weights) + folded BN + optional residual
    add + optional ReLU, all fused into one Pallas matmul."""
    cout, cin, kh, kw = w_oihw.shape
    xb = x.astype(jnp.bfloat16)
    if kh == 1 and kw == 1:
        # direct reshape path: no im2col / concat materialization
        if stride > 1:
            xb = xb[:, ::stride, ::stride, :]
        N, Ho, Wo, _ = xb.shape
        cols = xb.reshape(N * Ho * Wo, cin)
    else:
        cols, N, Ho, Wo = _im2col(xb, kh, kw, stride, pad)
    w2 = jnp.transpose(w_oihw, (2, 3, 1, 0)).reshape(kh * kw * cin, cout)
    res2 = None if residual is None else residual.reshape(N * Ho * Wo, cout)
    y = matmul_fused(cols, w2, scale, bias, res2, relu=relu)
    return y.reshape(N, Ho, Wo, cout)


@jax.jit
def maxpool_3x3_s2(x):
    N, H, W, C = x.shape
    xp = jnp.pad(x, ((0, 0), (1, 1), (1, 1), (0, 0)),
                 constant_values=-jnp.inf)
    Hp, Wp = H + 2, W + 2
    Ho, Wo = (Hp - 3) // 2 + 1, (Wp - 3) // 2 + 1
    wins = []
    for i in range(3):
        for j in range(3):
            wins.append(xp[:, i:i + Ho * 2:2, j:j + Wo * 2:2, :]
                        .reshape(N * Ho * Wo, C))
    out = _max9(wins)
    return out.reshape(N, Ho, Wo, C)


# ----------------------------------------------------------------------------
# Deterministic synthetic parameters (shapes of torchvision resnet50 + head)
# ----------------------------------------------------------------------------

class ParamGen:
    def __init__(self, key):
        self.key = key
        self.i = 0

    def _next(self):
        k = jax.random.fold_in(self.key, self.i)
        self.i += 1
        return k

    def conv(self, cout, cin, kh, kw):
        fan_in = cin * kh * kw
        return (jax.random.normal(self._next(), (cout, cin, kh, kw),
                                  jnp.float32)
                * jnp.sqrt(2.0 / fan_in))

    def bn(self, c):
        gamma = 0.5 + 0.05 * jax.random.normal(self._next(), (c,), jnp.float32)
        beta = 0.05 * jax.random.normal(self._next(), (c,), jnp.float32)
        mean = 0.05 * jax.random.normal(self._next(), (c,), jnp.float32)
        var = 1.0 + 0.1 * jnp.abs(
            jax.random.normal(self._next(), (c,), jnp.float32))
        scale = gamma / jnp.sqrt(var + 1e-5)           # folded eval-mode BN
        bias = beta - mean * scale
        return scale, bias

    def linear(self, cin, cout):
        w = (jax.random.normal(self._next(), (cout, cin), jnp.float32)
             * jnp.sqrt(1.0 / cin))
        b = 0.01 * jax.random.normal(self._next(), (cout,), jnp.float32)
        return w, b


def make_resnet50_params(key):
    pg = ParamGen(key)
    params = {"conv1_w": pg.conv(64, 3, 7, 7), "bn1": pg.bn(64)}
    layers_cfg = [(64, 3, 1), (128, 4, 2), (256, 6, 2), (512, 3, 2)]
    inplanes = 64
    layers = []
    for planes, nblocks, stride in layers_cfg:
        blocks = []
        for b in range(nblocks):
            s = stride if b == 0 else 1
            blk = {"stride": s}
            blk["w1"] = pg.conv(planes, inplanes, 1, 1)
            blk["s1"], blk["b1"] = pg.bn(planes)
            blk["w2"] = pg.conv(planes, planes, 3, 3)
            blk["s2"], blk["b2"] = pg.bn(planes)
            blk["w3"] = pg.conv(planes * 4, planes, 1, 1)
            blk["s3"], blk["b3"] = pg.bn(planes * 4)
            if s != 1 or inplanes != planes * 4:
                blk["wd"] = pg.conv(planes * 4, inplanes, 1, 1)
                blk["sd"], blk["bd"] = pg.bn(planes * 4)
            blocks.append(blk)
            inplanes = planes * 4
        layers.append(blocks)
    params["layers"] = layers
    params["fc_w"], params["fc_b"] = pg.linear(2048, 1000)   # resnet.fc
    params["cls_w"], params["cls_b"] = pg.linear(1000, 10)   # classifier
    return params


# ----------------------------------------------------------------------------
# Forward pass (mirrors torchvision resnet50 + nn.Linear(1000, 10))
# ----------------------------------------------------------------------------

def bottleneck(x, blk):
    s = blk["stride"]
    out = conv_bn(x, blk["w1"], blk["s1"], blk["b1"],
                  stride=1, pad=0, relu=True)
    out = conv_bn(out, blk["w2"], blk["s2"], blk["b2"],
                  stride=s, pad=1, relu=True)
    if "wd" in blk:
        shortcut = conv_bn(x, blk["wd"], blk["sd"], blk["bd"],
                           stride=s, pad=0, relu=False)
    else:
        shortcut = x
    # conv3 + BN + residual add + ReLU fused into one Pallas matmul epilogue
    out = conv_bn(out, blk["w3"], blk["s3"], blk["b3"], residual=shortcut,
                  stride=1, pad=0, relu=True)
    return out


def model_forward(x_nchw, params):
    x = jnp.transpose(x_nchw, (0, 2, 3, 1)).astype(jnp.float32)   # NCHW->NHWC
    s1, b1 = params["bn1"]
    x = conv_bn(x, params["conv1_w"], s1, b1, stride=2, pad=3, relu=True)
    x = maxpool_3x3_s2(x)
    for blocks in params["layers"]:
        for blk in blocks:
            x = bottleneck(x, blk)
    N, H, W, C = x.shape
    feat = global_avg_pool(x.reshape(N, H * W, C))                # (N, 2048)

    # Fold resnet.fc (2048->1000) and classifier (1000->10): both are affine,
    # so  cls(fc(x)) == x @ (fc_w.T @ cls_w.T) + (cls_w @ fc_b + cls_b).
    w_comb = params["fc_w"].T @ params["cls_w"].T                 # (2048, 10)
    b_comb = params["cls_w"] @ params["fc_b"] + params["cls_b"]   # (10,)
    out = matmul_fused(feat, w_comb, jnp.ones((10,), jnp.float32), b_comb,
                       relu=False)
    return out                                                    # (N, 10)


if __name__ == "__main__":
    params = make_resnet50_params(jax.random.PRNGKey(1))
    x = jax.random.normal(jax.random.PRNGKey(0), (2, 3, 32, 32), jnp.float32)
    y = jax.block_until_ready(model_forward(x, params))
    assert y.shape == (2, 10), y.shape
    assert bool(jnp.all(jnp.isfinite(y)))
    print("KERNEL_OK")
</pallas_src>

<mosaic_0001>
module attributes {stable_mosaic.version = 11 : i64} {
  func.func @_matmul_bn_kernel(%arg0: i32, %arg1: i32, %arg2: i32, %arg3: memref<256x256xbf16, #tpu.memory_space<vmem>>, %arg4: memref<256x128xbf16, #tpu.memory_space<vmem>>, %arg5: memref<1x128xf32, #tpu.memory_space<vmem>>, %arg6: memref<1x128xf32, #tpu.memory_space<vmem>>, %arg7: memref<256x128xf32, #tpu.memory_space<vmem>>) attributes {dimension_semantics = [#tpu.dimension_semantics<parallel>, #tpu.dimension_semantics<parallel>, #tpu.dimension_semantics<arbitrary>], iteration_bounds = array<i64: 2, 1, 1>, scalar_prefetch = 0 : i64, scratch_operands = 0 : i64, tpu.core_type = #tpu.core_type<tc>, window_params = [{transform_indices = @transform_0, window_bounds = array<i64: 256, 256>}, {transform_indices = @transform_1, window_bounds = array<i64: 256, 128>}, {transform_indices = @transform_2, window_bounds = array<i64: 1, 128>}, {transform_indices = @transform_3, window_bounds = array<i64: 1, 128>}, {transform_indices = @transform_4, window_bounds = array<i64: 256, 128>}]} {
    %c0_i32 = arith.constant 0 : i32
    %0 = arith.cmpi eq, %arg2, %c0_i32 : i32
    %1 = arith.extui %0 : i1 to i32
    %c0_i32_0 = arith.constant 0 : i32
    %2 = arith.cmpi ne, %1, %c0_i32_0 : i32
    scf.if %2 {
      %cst_10 = arith.constant 0.000000e+00 : f32
      %12 = vector.broadcast %cst_10 : f32 to vector<256x128xf32>
      %c0_11 = arith.constant 0 : index
      %c0_12 = arith.constant 0 : index
      %13 = vector.load %arg7[%c0_11, %c0_12] : memref<256x128xf32, #tpu.memory_space<vmem>>, vector<256x128xf32>
      tpu.vector_store %arg7[%c0_11, %c0_12], %12 {strides = array<i32>} : memref<256x128xf32, #tpu.memory_space<vmem>>, vector<256x128xf32>,
    } else {
    }
    %c0 = arith.constant 0 : index
    %c0_1 = arith.constant 0 : index
    %3 = vector.load %arg7[%c0, %c0_1] : memref<256x128xf32, #tpu.memory_space<vmem>>, vector<256x128xf32>
    %c0_2 = arith.constant 0 : index
    %c0_3 = arith.constant 0 : index
    %4 = vector.load %arg3[%c0_2, %c0_3] : memref<256x256xbf16, #tpu.memory_space<vmem>>, vector<256x256xbf16>
    %c0_4 = arith.constant 0 : index
    %c0_5 = arith.constant 0 : index
    %5 = vector.load %arg4[%c0_4, %c0_5] : memref<256x128xbf16, #tpu.memory_space<vmem>>, vector<256x128xbf16>
    %cst = arith.constant dense<0.000000e+00> : vector<256x128xf32>
    %6 = tpu.matmul %4, %5, %cst {dimension_numbers = #tpu.dot_dimension_numbers<[1], [0], [0], [1], [0, 0, 1, 1], [], []>} : vector<256x256xbf16>, vector<256x128xbf16>, vector<256x128xf32> -> vector<256x128xf32>
    %7 = arith.addf %3, %6 : vector<256x128xf32>
    %c0_6 = arith.constant 0 : index
    %c0_7 = arith.constant 0 : index
    %8 = vector.load %arg7[%c0_6, %c0_7] : memref<256x128xf32, #tpu.memory_space<vmem>>, vector<256x128xf32>
    tpu.vector_store %arg7[%c0_6, %c0_7], %7 {strides = array<i32>} : memref<256x128xf32, #tpu.memory_space<vmem>>, vector<256x128xf32>,
    %c0_i32_8 = arith.constant 0 : i32
    %9 = arith.cmpi eq, %arg2, %c0_i32_8 : i32
    %10 = arith.extui %9 : i1 to i32
    %c0_i32_9 = arith.constant 0 : i32
    %11 = arith.cmpi ne, %10, %c0_i32_9 : i32
    scf.if %11 {
      %c0_10 = arith.constant 0 : index
      %c0_11 = arith.constant 0 : index
      %12 = vector.load %arg7[%c0_10, %c0_11] : memref<256x128xf32, #tpu.memory_space<vmem>>, vector<256x128xf32>
      %c0_12 = arith.constant 0 : index
      %c0_13 = arith.constant 0 : index
      %13 = vector.load %arg5[%c0_12, %c0_13] : memref<1x128xf32, #tpu.memory_space<vmem>>, vector<1x128xf32>
      %14 = vector.broadcast %13 : vector<1x128xf32> to vector<256x128xf32>
      %15 = arith.mulf %12, %14 : vector<256x128xf32>
      %c0_14 = arith.constant 0 : index
      %c0_15 = arith.constant 0 : index
      %16 = vector.load %arg6[%c0_14, %c0_15] : memref<1x128xf32, #tpu.memory_space<vmem>>, vector<1x128xf32>
      %17 = vector.broadcast %16 : vector<1x128xf32> to vector<256x128xf32>
      %18 = arith.addf %15, %17 : vector<256x128xf32>
      %cst_16 = arith.constant 0.000000e+00 : f32
      %19 = vector.broadcast %cst_16 : f32 to vector<256x128xf32>
      %20 = arith.maximumf %18, %19 : vector<256x128xf32>
      %c0_17 = arith.constant 0 : index
      %c0_18 = arith.constant 0 : index
      %21 = vector.load %arg7[%c0_17, %c0_18] : memref<256x128xf32, #tpu.memory_space<vmem>>, vector<256x128xf32>
      tpu.vector_store %arg7[%c0_17, %c0_18], %20 {strides = array<i32>} : memref<256x128xf32, #tpu.memory_space<vmem>>, vector<256x128xf32>,
    } else {
    }
    return
  }
  func.func @transform_0(%arg0: i32, %arg1: i32, %arg2: i32) -> (i32, i32) {
    %c0_i32 = arith.constant 0 : i32
    return %arg0, %arg2 : i32, i32
  }
  func.func @transform_1(%arg0: i32, %arg1: i32, %arg2: i32) -> (i32, i32) {
    %c0_i32 = arith.constant 0 : i32
    return %arg2, %arg1 : i32, i32
  }
  func.func @transform_2(%arg0: i32, %arg1: i32, %arg2: i32) -> (i32, i32) {
    %c0_i32 = arith.constant 0 : i32
    %c0_i32_0 = arith.constant 0 : i32
    return %c0_i32, %arg1 : i32, i32
  }
  func.func @transform_3(%arg0: i32, %arg1: i32, %arg2: i32) -> (i32, i32) {
    %c0_i32 = arith.constant 0 : i32
    %c0_i32_0 = arith.constant 0 : i32
    return %c0_i32, %arg1 : i32, i32
  }
  func.func @transform_4(%arg0: i32, %arg1: i32, %arg2: i32) -> (i32, i32) {
    %c0_i32 = arith.constant 0 : i32
    return %arg0, %arg1 : i32, i32
  }
}

</mosaic_0001>

<bundles_post_ra>
// kernel: matmul_fused.1
= control target key start
LH: loop header
LB: loop body
LE: loop exit
PB: predicated region body
PF: predicated region fallthrough
CT: control target
= control target key end

     0   :  { %s1557_s15 = smov 0   ;;  %s1559_s16 = smov 0   ;;  %s1787_s0 = inlined_call_operand.vmem [shape: bf16[512,256], index: 0, kind: input, shape index: {}]   ;;  %s1788_s1 = inlined_call_operand.vmem [shape: bf16[256,128], index: 1, kind: input, shape index: {}]   ;;  %s1789_s2 = inlined_call_operand.vmem [shape: f32[1,128], index: 2, kind: input, shape index: {}]   ;;  %s1790_s3 = inlined_call_operand.vmem [shape: f32[1,128], index: 3, kind: input, shape index: {}]   ;;  %s1791_s4 = inlined_call_operand.vmem [shape: f32[512,128], index: 4, kind: output, shape index: {}]  }
   0x1   :  { %s1561_s17 = smov 0  }
   0x2 LB: > { %s33_s18 = sadd.s32 1, %s1526_s16  ;;  %p1232_p0 = scmp.ge.s32.totalorder %s1530_s17, 1  ;;  %s1530_s17 = sphi %s1561_s17, %s14_s17   ;;  %s1526_s16 = sphi %s1559_s16, %s1793_s16   ;;  %s1522_s15 = sphi %s1557_s15, %s1792_s15  }
   0x3   : > { %p35_p1 = scmp.ge.s32.totalorder %s33_s18, 2  ;;  %p224_p2 = scmp.lt.s32.totalorder %s1530_s17, 3 }
   0x5   : > { %s1795_s18 = smov (%p35_p1, %s33_s18), 0  ;;  %p225_p3 = pnand %p1232_p0, %p224_p2 }
   0x6   : > { %v1444_v0 = vld [vmem:[%s1788_s1 + $0x40] sm:$0xff] (!%p225_p3)   ;;  %s1233_s21 = sshll.u32 (!%p225_p3), %s1522_s15, 5  ;;  %v1446_v2 = vld [vmem:[%s1788_s1 + $0x48] sm:$0xff] (!%p225_p3)   ;;  %v1448_v4 = vld [vmem:[%s1788_s1 + $0x50] sm:$0xff] (!%p225_p3)  }
   0x7   : > { %228 = sbr.rel (%p225_p3) target bundleno = 319 (0x13f), region = 36  ;;  %v1445_v1 = vld [vmem:[%s1788_s1] sm:$0xff] (!%p225_p3)   ;;  %1291 = vmatprep.subr.bf16.mxu0 (!%p225_p3), %v1444_v0  ;;  %1403 = vmatprep.subr.bf16.mxu1 (!%p225_p3), %v1444_v0  ;;  %v1447_v3 = vld [vmem:[%s1788_s1 + $0x8] sm:$0xff] (!%p225_p3)   ;;  %p274_p4 = scmp.lt.s32.totalorder (!%p225_p3), %s1233_s21, 63  ;;  %v1449_v5 = vld [vmem:[%s1788_s1 + $0x10] sm:$0xff] (!%p225_p3)  }
   0x8   : > { %1292 = vmatpush3.bf16.msra.mxu0 (!%p225_p3), %v1445_v1  ;;  %1411 = vmatpush3.bf16.msra.mxu1 (!%p225_p3), %v1445_v1  ;;  %v1450_v6 = vld [vmem:[%s1788_s1 + $0x58] sm:$0xff] (!%p225_p3)   ;;  %v1452_v8 = vld [vmem:[%s1788_s1 + $0x60] sm:$0xff] (!%p225_p3)   ;;  %v1454_v10 = vld [vmem:[%s1788_s1 + $0x68] sm:$0xff] (!%p225_p3)  }
   0x9   : > { %1293 = vmatprep.subr.bf16.mxu0 (!%p225_p3), %v1446_v2  ;;  %1404 = vmatprep.subr.bf16.mxu1 (!%p225_p3), %v1446_v2  ;;  %v1451_v7 = vld [vmem:[%s1788_s1 + $0x18] sm:$0xff] (!%p225_p3)   ;;  %v1453_v9 = vld [vmem:[%s1788_s1 + $0x20] sm:$0xff] (!%p225_p3)   ;;  %v1455_v13 = vld [vmem:[%s1788_s1 + $0x28] sm:$0xff] (!%p225_p3)  }
   0xa   : > { %v1456_v14 = vld [vmem:[%s1788_s1 + $0x70] sm:$0xff] (!%p225_p3)   ;;  %v1458_v16 = vld [vmem:[%s1788_s1 + $0x78] sm:$0xff] (!%p225_p3)   ;;  %v1668_v56 = vld [vmem:[%s1789_s2] ss:$0 sm:$0xff] (!%p225_p3) }
   0xb   : > { %v1457_v15 = vld [vmem:[%s1788_s1 + $0x30] sm:$0xff] (!%p225_p3)   ;;  %v1459_v17 = vld [vmem:[%s1788_s1 + $0x38] sm:$0xff] (!%p225_p3)   ;;  %v1673_v61 = vld [vmem:[%s1790_s3] ss:$0 sm:$0xff] (!%p225_p3) }
   0xc   : > { %1294 = vmatpush3.bf16.msra.mxu0 (!%p225_p3), %v1447_v3  ;;  %1412 = vmatpush3.bf16.msra.mxu1 (!%p225_p3), %v1447_v3 }
   0xd   : > { %1295 = vmatprep.subr.bf16.mxu0 (!%p225_p3), %v1448_v4  ;;  %1405 = vmatprep.subr.bf16.mxu1 (!%p225_p3), %v1448_v4 }
   0xe   : > { %s1797_s21 = smov (!%p274_p4, %s1233_s21), 63 }
   0xf   : > { %s1290_s10 = sshll.u32 %s1797_s21, 3 }
  0x10   : > { %1296 = vmatpush3.bf16.msra.mxu0 %v1449_v5  ;;  %1413 = vmatpush3.bf16.msra.mxu1 %v1449_v5  ;;  %s1610_s15 = scalar_lea.vmem %s1787_s0, %s1290_s10 }
  0x11   : > { %1297 = vmatprep.subr.bf16.mxu0 %v1450_v6  ;;  %1406 = vmatprep.subr.bf16.mxu1 %v1450_v6  ;;  %v1462_v11 = vld [vmem:[%s1610_s15 + $0x4] ss:$8 sps:$4 sm:$0xff]   ;;  %v1460_v18 = vld [vmem:[%s1610_s15] ss:$8 sps:$4 sm:$0xff]   ;;  %v1466_v20 = vld [vmem:[%s1610_s15 + $0x14] ss:$8 sps:$4 sm:$0xff]  }
  0x12   : > { %v1465_v12 = vld [vmem:[%s1610_s15 + $0x84] ss:$8 sps:$4 sm:$0xff]   ;;  %729 = vmatprep.mubr.bf16.mxu0 %v1462_v11  ;;  %v1463_v19 = vld [vmem:[%s1610_s15 + $0x80] ss:$8 sps:$4 sm:$0xff]   ;;  %v1468_v21 = vld [vmem:[%s1610_s15 + $0x94] ss:$8 sps:$4 sm:$0xff]  }
  0x13   : > { %793 = vmatprep.mubr.bf16.mxu1 %v1465_v12  ;;  %v1470_v22 = vld [vmem:[%s1610_s15 + $0x10] ss:$8 sps:$4 sm:$0xff]   ;;  %v1472_v24 = vld [vmem:[%s1610_s15 + $0x24] ss:$8 sps:$4 sm:$0xff]   ;;  %v1476_v26 = vld [vmem:[%s1610_s15 + $0x20] ss:$8 sps:$4 sm:$0xff]  }
  0x14   : > { %1298 = vmatpush3.bf16.msra.mxu0 %v1451_v7  ;;  %1414 = vmatpush3.bf16.msra.mxu1 %v1451_v7  ;;  %v1471_v23 = vld [vmem:[%s1610_s15 + $0x90] ss:$8 sps:$4 sm:$0xff]   ;;  %v1474_v25 = vld [vmem:[%s1610_s15 + $0xa4] ss:$8 sps:$4 sm:$0xff]   ;;  %v1477_v27 = vld [vmem:[%s1610_s15 + $0xa0] ss:$8 sps:$4 sm:$0xff]  }
  0x15   : > { %1299 = vmatprep.subr.bf16.mxu0 %v1452_v8  ;;  %1407 = vmatprep.subr.bf16.mxu1 %v1452_v8  ;;  %v1478_v28 = vld [vmem:[%s1610_s15 + $0x34] ss:$8 sps:$4 sm:$0xff]   ;;  %v1482_v30 = vld [vmem:[%s1610_s15 + $0x30] ss:$8 sps:$4 sm:$0xff]   ;;  %v1484_v32 = vld [vmem:[%s1610_s15 + $0x44] ss:$8 sps:$4 sm:$0xff]  }
  0x16   : > { %v1480_v29 = vld [vmem:[%s1610_s15 + $0xb4] ss:$8 sps:$4 sm:$0xff]   ;;  %v1483_v31 = vld [vmem:[%s1610_s15 + $0xb0] ss:$8 sps:$4 sm:$0xff]   ;;  %v1486_v33 = vld [vmem:[%s1610_s15 + $0xc4] ss:$8 sps:$4 sm:$0xff]  }
  0x17   : > { %v1488_v34 = vld [vmem:[%s1610_s15 + $0x40] ss:$8 sps:$4 sm:$0xff]   ;;  %v1490_v36 = vld [vmem:[%s1610_s15 + $0x54] ss:$8 sps:$4 sm:$0xff]   ;;  %v1494_v38 = vld [vmem:[%s1610_s15 + $0x50] ss:$8 sps:$4 sm:$0xff]  }
  0x18   : > { %1300 = vmatpush3.bf16.msra.mxu0 %v1453_v9  ;;  %1415 = vmatpush3.bf16.msra.mxu1 %v1453_v9  ;;  %v1489_v35 = vld [vmem:[%s1610_s15 + $0xc0] ss:$8 sps:$4 sm:$0xff]   ;;  %v1492_v37 = vld [vmem:[%s1610_s15 + $0xd4] ss:$8 sps:$4 sm:$0xff]   ;;  %v1495_v39 = vld [vmem:[%s1610_s15 + $0xd0] ss:$8 sps:$4 sm:$0xff]  }
  0x19   : > { %1301 = vmatprep.subr.bf16.mxu0 %v1454_v10  ;;  %1408 = vmatprep.subr.bf16.mxu1 %v1454_v10  ;;  %v1496_v40 = vld [vmem:[%s1610_s15 + $0x64] ss:$8 sps:$4 sm:$0xff]   ;;  %v1500_v42 = vld [vmem:[%s1610_s15 + $0x60] ss:$8 sps:$4 sm:$0xff]   ;;  %v1502_v44 = vld [vmem:[%s1610_s15 + $0x74] ss:$8 sps:$4 sm:$0xff]  }
  0x1a   : > { %v1498_v41 = vld [vmem:[%s1610_s15 + $0xe4] ss:$8 sps:$4 sm:$0xff]   ;;  %v1501_v43 = vld [vmem:[%s1610_s15 + $0xe0] ss:$8 sps:$4 sm:$0xff]   ;;  %v1504_v45 = vld [vmem:[%s1610_s15 + $0xf4] ss:$8 sps:$4 sm:$0xff]  }
  0x1b   : > { %v1506_v46 = vld [vmem:[%s1610_s15 + $0x70] ss:$8 sps:$4 sm:$0xff]  }
  0x1c   : > { %1302 = vmatpush3.bf16.msra.mxu0 %v1455_v13  ;;  %1416 = vmatpush3.bf16.msra.mxu1 %v1455_v13  ;;  %v1507_v47 = vld [vmem:[%s1610_s15 + $0xf0] ss:$8 sps:$4 sm:$0xff]   ;;  %s1686_s15 = scalar_lea.vmem %s1791_s4, %s1290_s10 }
  0x1d   : > { %1303 = vmatprep.subr.bf16.mxu0 %v1456_v14  ;;  %1409 = vmatprep.subr.bf16.mxu1 %v1456_v14 }
  0x20   : > { %1304 = vmatpush3.bf16.msra.mxu0 %v1457_v15  ;;  %1417 = vmatpush3.bf16.msra.mxu1 %v1457_v15 }
  0x21   : > { %1305 = vmatprep.subr.bf16.mxu0 %v1458_v16  ;;  %1410 = vmatprep.subr.bf16.mxu1 %v1458_v16 }
  0x24   : > { %1306 = vmatpush3.bf16.msra.mxu0 %v1459_v17  ;;  %1418 = vmatpush3.bf16.msra.mxu1 %v1459_v17 }
  0x27   : > { %730 = vmatmul.mubr.bf16.vlgmr.msra.gmra.mrb[0].mxu0 %v1460_v18  ;;  %794 = vmatmul.mubr.bf16.vlgmr.msra.gmra.mrb[0].mxu1 %v1463_v19 }
  0x28   : > { %737 = vmatprep.mubr.bf16.mxu0 %v1466_v20  ;;  %801 = vmatprep.mubr.bf16.mxu1 %v1468_v21 }
  0x2f   : > { %738 = vmatmul.mubr.bf16.gmra.mrb[4].mxu0 %v1470_v22  ;;  %802 = vmatmul.mubr.bf16.gmra.mrb[4].mxu1 %v1471_v23 }
  0x30   : > { %745 = vmatprep.mubr.bf16.mxu0 %v1472_v24  ;;  %809 = vmatprep.mubr.bf16.mxu1 %v1474_v25 }
  0x37   : > { %746 = vmatmul.mubr.bf16.gmra.mrb[8].mxu0 %v1476_v26  ;;  %810 = vmatmul.mubr.bf16.gmra.mrb[8].mxu1 %v1477_v27 }
  0x38   : > { %753 = vmatprep.mubr.bf16.mxu0 %v1478_v28  ;;  %817 = vmatprep.mubr.bf16.mxu1 %v1480_v29 }
  0x3f   : > { %754 = vmatmul.mubr.bf16.gmra.mrb[12].mxu0 %v1482_v30  ;;  %818 = vmatmul.mubr.bf16.gmra.mrb[12].mxu1 %v1483_v31 }
  0x40   : > { %761 = vmatprep.mubr.bf16.mxu0 %v1484_v32  ;;  %825 = vmatprep.mubr.bf16.mxu1 %v1486_v33 }
  0x47   : > { %762 = vmatmul.mubr.bf16.gmra.mrb[16].mxu0 %v1488_v34  ;;  %826 = vmatmul.mubr.bf16.gmra.mrb[16].mxu1 %v1489_v35 }
  0x48   : > { %769 = vmatprep.mubr.bf16.mxu0 %v1490_v36  ;;  %833 = vmatprep.mubr.bf16.mxu1 %v1492_v37 }
  0x4f   : > { %770 = vmatmul.mubr.bf16.gmra.mrb[20].mxu0 %v1494_v38  ;;  %834 = vmatmul.mubr.bf16.gmra.mrb[20].mxu1 %v1495_v39 }
  0x50   : > { %777 = vmatprep.mubr.bf16.mxu0 %v1496_v40  ;;  %841 = vmatprep.mubr.bf16.mxu1 %v1498_v41 }
  0x57   : > { %778 = vmatmul.mubr.bf16.gmra.mrb[24].mxu0 %v1500_v42  ;;  %842 = vmatmul.mubr.bf16.gmra.mrb[24].mxu1 %v1501_v43 }
  0x58   : > { %785 = vmatprep.mubr.bf16.mxu0 %v1502_v44  ;;  %849 = vmatprep.mubr.bf16.mxu1 %v1504_v45 }
  0x5f   : > { %786 = vmatmul.mubr.bf16.gmra.mrb[28].mxu0 %v1506_v46  ;;  %850 = vmatmul.mubr.bf16.gmra.mrb[28].mxu1 %v1507_v47 }
  0xfa   : > { %v1307_v48 = vpop.f32.mrb[0].mxu0  ;;  %v1355_v49 = vpop.f32.mrb[0].mxu1 }
  0xfb   : > { %v1308_v50 = vpop.f32.mrb[1].mxu0  ;;  %v1356_v51 = vpop.f32.mrb[1].mxu1 }
  0xfc   : > { %v1309_v52 = vadd.f32 %v1308_v50, %v1307_v48  ;;  %v1357_v53 = vadd.f32 %v1356_v51, %v1355_v49  ;;  %v1310_v54 = vpop.f32.mrb[2].mxu0  ;;  %v1358_v55 = vpop.f32.mrb[2].mxu1 }
  0xfd   : > { %v1311_v57 = vpop.f32.mrb[3].mxu0  ;;  %v1359_v58 = vpop.f32.mrb[3].mxu1 }
  0xfe   : > { %v1312_v59 = vadd.f32 %v1311_v57, %v1310_v54  ;;  %v1360_v60 = vadd.f32 %v1359_v58, %v1358_v55  ;;  %v964_v62 = vmul.f32 %v1309_v52, %v1668_v56  ;;  %v980_v63 = vmul.f32 %v1357_v53, %v1668_v56 }
 0x100   : > { %v1003_v0 = vadd.f32 %v1673_v61, %v964_v62  ;;  %v1019_v1 = vadd.f32 %v1673_v61, %v980_v63  ;;  %v965_v2 = vmul.f32 %v1312_v59, %v1668_v56  ;;  %v981_v3 = vmul.f32 %v1360_v60, %v1668_v56 }
 0x102   : > { %v1313_v4 = vpop.f32.mrb[4].mxu0  ;;  %v1361_v5 = vpop.f32.mrb[4].mxu1  ;;  %v1035_v8 = vmax.f32 %v1003_v0, 0.0  ;;  %v1051_v9 = vmax.f32 %v1019_v1, 0.0  ;;  %v1004_v10 = vadd.f32 %v1673_v61, %v965_v2  ;;  %v1020_v11 = vadd.f32 %v1673_v61, %v981_v3 }
 0x103   : > { %v1314_v6 = vpop.f32.mrb[5].mxu0  ;;  %v1362_v7 = vpop.f32.mrb[5].mxu1 }
 0x104   : > { %v1316_v12 = vpop.f32.mrb[6].mxu0  ;;  %v1364_v13 = vpop.f32.mrb[6].mxu1  ;;  %v1315_v14 = vadd.f32 %v1314_v6, %v1313_v4  ;;  %v1363_v15 = vadd.f32 %v1362_v7, %v1361_v5  ;;  %1067 = vst [vmem:[%s1686_s15] sm:$0xff] %v1035_v8  ;;  %1083 = vst [vmem:[%s1686_s15 + $0x80] sm:$0xff] %v1051_v9  ;;  %v1036_v18 = vmax.f32 %v1004_v10, 0.0  ;;  %v1052_v19 = vmax.f32 %v1020_v11, 0.0 }
 0x105   : > { %v1317_v16 = vpop.f32.mrb[7].mxu0  ;;  %v1365_v17 = vpop.f32.mrb[7].mxu1 }
 0x106   : > { %v1318_v20 = vadd.f32 %v1317_v16, %v1316_v12  ;;  %v1366_v21 = vadd.f32 %v1365_v17, %v1364_v13  ;;  %1068 = vst [vmem:[%s1686_s15 + $0x8] sm:$0xff] %v1036_v18  ;;  %1084 = vst [vmem:[%s1686_s15 + $0x88] sm:$0xff] %v1052_v19  ;;  %v966_v22 = vmul.f32 %v1315_v14, %v1668_v56 }
 0x107   : > { %v982_v23 = vmul.f32 %v1363_v15, %v1668_v56 }
 0x108   : > { %v967_v24 = vmul.f32 %v1318_v20, %v1668_v56  ;;  %v983_v25 = vmul.f32 %v1366_v21, %v1668_v56  ;;  %v1005_v28 = vadd.f32 %v1673_v61, %v966_v22 }
 0x109   : > { %v1021_v29 = vadd.f32 %v1673_v61, %v982_v23 }
 0x10a   : > { %v1319_v26 = vpop.f32.mrb[8].mxu0  ;;  %v1367_v27 = vpop.f32.mrb[8].mxu1  ;;  %v1006_v32 = vadd.f32 %v1673_v61, %v967_v24  ;;  %v1022_v33 = vadd.f32 %v1673_v61, %v983_v25  ;;  %v1037_v38 = vmax.f32 %v1005_v28, 0.0 }
 0x10b   : > { %v1320_v30 = vpop.f32.mrb[9].mxu0  ;;  %v1368_v31 = vpop.f32.mrb[9].mxu1  ;;  %v1053_v39 = vmax.f32 %v1021_v29, 0.0 }
 0x10c   : > { %v1321_v34 = vadd.f32 %v1320_v30, %v1319_v26  ;;  %v1369_v35 = vadd.f32 %v1368_v31, %v1367_v27  ;;  %v1322_v36 = vpop.f32.mrb[10].mxu0  ;;  %v1370_v37 = vpop.f32.mrb[10].mxu1  ;;  %v1038_v42 = vmax.f32 %v1006_v32, 0.0  ;;  %v1054_v43 = vmax.f32 %v1022_v33, 0.0  ;;  %1069 = vst [vmem:[%s1686_s15 + $0x10] sm:$0xff] %v1037_v38 }
 0x10d   : > { %v1323_v40 = vpop.f32.mrb[11].mxu0  ;;  %v1371_v41 = vpop.f32.mrb[11].mxu1  ;;  %1085 = vst [vmem:[%s1686_s15 + $0x90] sm:$0xff] %v1053_v39 }
 0x10e   : > { %v1324_v44 = vadd.f32 %v1323_v40, %v1322_v36  ;;  %v1372_v45 = vadd.f32 %v1371_v41, %v1370_v37  ;;  %1070 = vst [vmem:[%s1686_s15 + $0x18] sm:$0xff] %v1038_v42  ;;  %1086 = vst [vmem:[%s1686_s15 + $0x98] sm:$0xff] %v1054_v43  ;;  %v968_v46 = vmul.f32 %v1321_v34, %v1668_v56 }
 0x10f   : > { %v984_v47 = vmul.f32 %v1369_v35, %v1668_v56 }
 0x110   : > { %v1007_v48 = vadd.f32 %v1673_v61, %v968_v46  ;;  %v969_v52 = vmul.f32 %v1324_v44, %v1668_v56  ;;  %v985_v53 = vmul.f32 %v1372_v45, %v1668_v56 }
 0x111   : > { %v1023_v49 = vadd.f32 %v1673_v61, %v984_v47 }
 0x112   : > { %v1325_v50 = vpop.f32.mrb[12].mxu0  ;;  %v1373_v51 = vpop.f32.mrb[12].mxu1  ;;  %v1039_v57 = vmax.f32 %v1007_v48, 0.0  ;;  %v1008_v0 = vadd.f32 %v1673_v61, %v969_v52  ;;  %v1024_v1 = vadd.f32 %v1673_v61, %v985_v53 }
 0x113   : > { %v1326_v54 = vpop.f32.mrb[13].mxu0  ;;  %v1374_v55 = vpop.f32.mrb[13].mxu1  ;;  %v1055_v58 = vmax.f32 %v1023_v49, 0.0 }
 0x114   : > { %v1327_v59 = vadd.f32 %v1326_v54, %v1325_v50  ;;  %v1375_v60 = vadd.f32 %v1374_v55, %v1373_v51  ;;  %v1328_v62 = vpop.f32.mrb[14].mxu0  ;;  %v1376_v63 = vpop.f32.mrb[14].mxu1  ;;  %1071 = vst [vmem:[%s1686_s15 + $0x20] sm:$0xff] %v1039_v57  ;;  %v1040_v6 = vmax.f32 %v1008_v0, 0.0  ;;  %v1056_v7 = vmax.f32 %v1024_v1, 0.0 }
 0x115   : > { %v1329_v2 = vpop.f32.mrb[15].mxu0  ;;  %v1377_v3 = vpop.f32.mrb[15].mxu1  ;;  %1087 = vst [vmem:[%s1686_s15 + $0xa0] sm:$0xff] %v1055_v58 }
 0x116   : > { %v1330_v4 = vadd.f32 %v1329_v2, %v1328_v62  ;;  %v1378_v5 = vadd.f32 %v1377_v3, %v1376_v63  ;;  %v970_v8 = vmul.f32 %v1327_v59, %v1668_v56  ;;  %v986_v9 = vmul.f32 %v1375_v60, %v1668_v56  ;;  %1072 = vst [vmem:[%s1686_s15 + $0x28] sm:$0xff] %v1040_v6 }
 0x117   : > { %1088 = vst [vmem:[%s1686_s15 + $0xa8] sm:$0xff] %v1056_v7 }
 0x118   : > { %v1009_v10 = vadd.f32 %v1673_v61, %v970_v8  ;;  %v1025_v11 = vadd.f32 %v1673_v61, %v986_v9  ;;  %v971_v12 = vmul.f32 %v1330_v4, %v1668_v56  ;;  %v987_v13 = vmul.f32 %v1378_v5, %v1668_v56 }
 0x11a   : > { %v1331_v14 = vpop.f32.mrb[16].mxu0  ;;  %v1379_v15 = vpop.f32.mrb[16].mxu1  ;;  %v1041_v18 = vmax.f32 %v1009_v10, 0.0  ;;  %v1057_v19 = vmax.f32 %v1025_v11, 0.0  ;;  %v1010_v20 = vadd.f32 %v1673_v61, %v971_v12  ;;  %v1026_v21 = vadd.f32 %v1673_v61, %v987_v13 }
 0x11b   : > { %v1332_v16 = vpop.f32.mrb[17].mxu0  ;;  %v1380_v17 = vpop.f32.mrb[17].mxu1 }
 0x11c   : > { %v1334_v22 = vpop.f32.mrb[18].mxu0  ;;  %v1382_v23 = vpop.f32.mrb[18].mxu1  ;;  %v1333_v24 = vadd.f32 %v1332_v16, %v1331_v14  ;;  %v1381_v25 = vadd.f32 %v1380_v17, %v1379_v15  ;;  %1073 = vst [vmem:[%s1686_s15 + $0x30] sm:$0xff] %v1041_v18  ;;  %1089 = vst [vmem:[%s1686_s15 + $0xb0] sm:$0xff] %v1057_v19  ;;  %v1042_v28 = vmax.f32 %v1010_v20, 0.0  ;;  %v1058_v29 = vmax.f32 %v1026_v21, 0.0 }
 0x11d   : > { %v1335_v26 = vpop.f32.mrb[19].mxu0  ;;  %v1383_v27 = vpop.f32.mrb[19].mxu1 }
 0x11e   : > { %v1336_v30 = vadd.f32 %v1335_v26, %v1334_v22  ;;  %v1384_v31 = vadd.f32 %v1383_v27, %v1382_v23  ;;  %1074 = vst [vmem:[%s1686_s15 + $0x38] sm:$0xff] %v1042_v28  ;;  %1090 = vst [vmem:[%s1686_s15 + $0xb8] sm:$0xff] %v1058_v29  ;;  %v972_v32 = vmul.f32 %v1333_v24, %v1668_v56 }
 0x11f   : > { %v988_v33 = vmul.f32 %v1381_v25, %v1668_v56 }
 0x120   : > { %v973_v34 = vmul.f32 %v1336_v30, %v1668_v56  ;;  %v989_v35 = vmul.f32 %v1384_v31, %v1668_v56  ;;  %v1011_v38 = vadd.f32 %v1673_v61, %v972_v32 }
 0x121   : > { %v1027_v39 = vadd.f32 %v1673_v61, %v988_v33 }
 0x122   : > { %v1337_v36 = vpop.f32.mrb[20].mxu0  ;;  %v1385_v37 = vpop.f32.mrb[20].mxu1  ;;  %v1012_v42 = vadd.f32 %v1673_v61, %v973_v34  ;;  %v1028_v43 = vadd.f32 %v1673_v61, %v989_v35  ;;  %v1043_v48 = vmax.f32 %v1011_v38, 0.0 }
 0x123   : > { %v1338_v40 = vpop.f32.mrb[21].mxu0  ;;  %v1386_v41 = vpop.f32.mrb[21].mxu1  ;;  %v1059_v49 = vmax.f32 %v1027_v39, 0.0 }
 0x124   : > { %v1339_v44 = vadd.f32 %v1338_v40, %v1337_v36  ;;  %v1387_v45 = vadd.f32 %v1386_v41, %v1385_v37  ;;  %v1340_v46 = vpop.f32.mrb[22].mxu0  ;;  %v1388_v47 = vpop.f32.mrb[22].mxu1  ;;  %v1044_v52 = vmax.f32 %v1012_v42, 0.0  ;;  %v1060_v53 = vmax.f32 %v1028_v43, 0.0  ;;  %1075 = vst [vmem:[%s1686_s15 + $0x40] sm:$0xff] %v1043_v48 }
 0x125   : > { %v1341_v50 = vpop.f32.mrb[23].mxu0  ;;  %v1389_v51 = vpop.f32.mrb[23].mxu1  ;;  %1091 = vst [vmem:[%s1686_s15 + $0xc0] sm:$0xff] %v1059_v49 }
 0x126   : > { %v1342_v54 = vadd.f32 %v1341_v50, %v1340_v46  ;;  %v1390_v55 = vadd.f32 %v1389_v51, %v1388_v47  ;;  %1076 = vst [vmem:[%s1686_s15 + $0x48] sm:$0xff] %v1044_v52  ;;  %1092 = vst [vmem:[%s1686_s15 + $0xc8] sm:$0xff] %v1060_v53  ;;  %v974_v57 = vmul.f32 %v1339_v44, %v1668_v56 }
 0x127   : > { %v990_v58 = vmul.f32 %v1387_v45, %v1668_v56 }
 0x128   : > { %v1013_v59 = vadd.f32 %v1673_v61, %v974_v57  ;;  %v975_v0 = vmul.f32 %v1342_v54, %v1668_v56  ;;  %v991_v1 = vmul.f32 %v1390_v55, %v1668_v56 }
 0x129   : > { %v1029_v60 = vadd.f32 %v1673_v61, %v990_v58 }
 0x12a   : > { %v1343_v62 = vpop.f32.mrb[24].mxu0  ;;  %v1391_v63 = vpop.f32.mrb[24].mxu1  ;;  %v1045_v4 = vmax.f32 %v1013_v59, 0.0  ;;  %v1014_v10 = vadd.f32 %v1673_v61, %v975_v0  ;;  %v1030_v11 = vadd.f32 %v1673_v61, %v991_v1 }
 0x12b   : > { %v1344_v2 = vpop.f32.mrb[25].mxu0  ;;  %v1392_v3 = vpop.f32.mrb[25].mxu1  ;;  %v1061_v5 = vmax.f32 %v1029_v60, 0.0 }
 0x12c   : > { %v1345_v6 = vadd.f32 %v1344_v2, %v1343_v62  ;;  %v1393_v7 = vadd.f32 %v1392_v3, %v1391_v63  ;;  %v1346_v8 = vpop.f32.mrb[26].mxu0  ;;  %v1394_v9 = vpop.f32.mrb[26].mxu1  ;;  %1077 = vst [vmem:[%s1686_s15 + $0x50] sm:$0xff] %v1045_v4  ;;  %v1046_v16 = vmax.f32 %v1014_v10, 0.0  ;;  %v1062_v17 = vmax.f32 %v1030_v11, 0.0 }
 0x12d   : > { %v1347_v12 = vpop.f32.mrb[27].mxu0  ;;  %v1395_v13 = vpop.f32.mrb[27].mxu1  ;;  %1093 = vst [vmem:[%s1686_s15 + $0xd0] sm:$0xff] %v1061_v5 }
 0x12e   : > { %v1348_v14 = vadd.f32 %v1347_v12, %v1346_v8  ;;  %v1396_v15 = vadd.f32 %v1395_v13, %v1394_v9  ;;  %v976_v18 = vmul.f32 %v1345_v6, %v1668_v56  ;;  %v992_v19 = vmul.f32 %v1393_v7, %v1668_v56  ;;  %1078 = vst [vmem:[%s1686_s15 + $0x58] sm:$0xff] %v1046_v16 }
 0x12f   : > { %1094 = vst [vmem:[%s1686_s15 + $0xd8] sm:$0xff] %v1062_v17 }
 0x130   : > { %v1015_v20 = vadd.f32 %v1673_v61, %v976_v18  ;;  %v1031_v21 = vadd.f32 %v1673_v61, %v992_v19  ;;  %v977_v22 = vmul.f32 %v1348_v14, %v1668_v56  ;;  %v993_v23 = vmul.f32 %v1396_v15, %v1668_v56 }
 0x132   : > { %v1349_v24 = vpop.f32.mrb[28].mxu0  ;;  %v1397_v25 = vpop.f32.mrb[28].mxu1  ;;  %v1047_v28 = vmax.f32 %v1015_v20, 0.0  ;;  %v1063_v29 = vmax.f32 %v1031_v21, 0.0  ;;  %v1016_v30 = vadd.f32 %v1673_v61, %v977_v22  ;;  %v1032_v31 = vadd.f32 %v1673_v61, %v993_v23 }
 0x133   : > { %v1350_v26 = vpop.f32.mrb[29].mxu0  ;;  %v1398_v27 = vpop.f32.mrb[29].mxu1 }
 0x134   : > { %v1352_v32 = vpop.f32.mrb[30].mxu0  ;;  %v1400_v33 = vpop.f32.mrb[30].mxu1  ;;  %v1351_v34 = vadd.f32 %v1350_v26, %v1349_v24  ;;  %v1399_v35 = vadd.f32 %v1398_v27, %v1397_v25  ;;  %1079 = vst [vmem:[%s1686_s15 + $0x60] sm:$0xff] %v1047_v28  ;;  %1095 = vst [vmem:[%s1686_s15 + $0xe0] sm:$0xff] %v1063_v29  ;;  %v1048_v38 = vmax.f32 %v1016_v30, 0.0  ;;  %v1064_v39 = vmax.f32 %v1032_v31, 0.0 }
 0x135   : > { %v1353_v36 = vpop.f32.mrb[31].mxu0  ;;  %v1401_v37 = vpop.f32.mrb[31].mxu1 }
 0x136   : > { %v1354_v40 = vadd.f32 %v1353_v36, %v1352_v32  ;;  %v1402_v41 = vadd.f32 %v1401_v37, %v1400_v33  ;;  %1080 = vst [vmem:[%s1686_s15 + $0x68] sm:$0xff] %v1048_v38  ;;  %1096 = vst [vmem:[%s1686_s15 + $0xe8] sm:$0xff] %v1064_v39  ;;  %v978_v42 = vmul.f32 %v1351_v34, %v1668_v56 }
 0x137   : > { %v994_v43 = vmul.f32 %v1399_v35, %v1668_v56 }
 0x138   : > { %v979_v44 = vmul.f32 %v1354_v40, %v1668_v56  ;;  %v995_v45 = vmul.f32 %v1402_v41, %v1668_v56  ;;  %v1017_v46 = vadd.f32 %v1673_v61, %v978_v42 }
 0x139   : > { %v1033_v47 = vadd.f32 %v1673_v61, %v994_v43 }
 0x13a   : > { %v1018_v48 = vadd.f32 %v1673_v61, %v979_v44  ;;  %v1034_v49 = vadd.f32 %v1673_v61, %v995_v45  ;;  %v1049_v50 = vmax.f32 %v1017_v46, 0.0 }
 0x13b   : > { %v1065_v51 = vmax.f32 %v1033_v47, 0.0 }
 0x13c   : > { %v1050_v52 = vmax.f32 %v1018_v48, 0.0  ;;  %v1066_v53 = vmax.f32 %v1034_v49, 0.0  ;;  %1081 = vst [vmem:[%s1686_s15 + $0x70] sm:$0xff] %v1049_v50 }
 0x13d   : > { %1097 = vst [vmem:[%s1686_s15 + $0xf0] sm:$0xff] %v1065_v51 }
 0x13e   : > { %1082 = vst [vmem:[%s1686_s15 + $0x78] sm:$0xff] %v1050_v52  ;;  %1098 = vst [vmem:[%s1686_s15 + $0xf8] sm:$0xff] %v1066_v53 }
 0x13f PF: > { %s14_s17 = sadd.s32 1, %s1530_s17   ;;  %s1792_s15 = smov %s1526_s16 }
 0x140   : > { %p11_p5 = scmp.ge.s32.totalorder %s14_s17, 4   ;;  %s1793_s16 = smov %s1795_s18 }
 0x142   :  { %13 = sbr.rel (!%p11_p5) target bundleno = 2 (0x2), region = 83 }

</bundles_post_ra>
